<compile_context>
chip_gen: v6e
topology: v6e:2x2x1
jax: 0.10.0
libtpu: 0.0.40
codegen_flags: <defaults>
</compile_context>

<pallas_src>
import jax
import jax.numpy as jnp
from jax.experimental import pallas as pl
from jax.experimental.pallas import tpu as pltpu


def critic_block_kernel(x_ref, w1_ref, b1_ref, w2_ref, b2_ref, o_ref):
    # Layer1: x @ W1 + b1   (MXU, f32 accumulation)
    h = jnp.dot(x_ref[...], w1_ref[...],
                preferred_element_type=jnp.float32) + b1_ref[...]

    # LeakyReLU(negative_slope=0.1)   (VPU, f32)
    h = jnp.where(h >= 0.0, h, 0.1 * h)

    # LayerNorm over last dim (eps=1e-5); affine already folded into W2/b2.
    mean = jnp.mean(h, axis=-1, keepdims=True)
    centered = h - mean
    var = jnp.mean(centered * centered, axis=-1, keepdims=True)
    inv_std = jax.lax.rsqrt(var + 1e-5)          # EUP slot -> effectively free
    hn = (centered * inv_std).astype(w2_ref.dtype)

    # Layer2 (with folded affine): hn @ W2' + b2'   (MXU)
    out = jnp.dot(hn, w2_ref[...], preferred_element_type=jnp.float32) + b2_ref[...]
    o_ref[...] = out.astype(o_ref.dtype)


def _round_up(n, m):
    return ((n + m - 1) // m) * m


def _pick_batch_tile(B, F, H, O, x_itemsize, sublane, vmem_budget=24 << 20):
    """Largest batch tile (<=512) whose double-buffered footprint fits the budget.

    Budget is conservative (fits v7x's 32 MiB default scoped VMEM with headroom);
    weights are counted once since they are resident across all grid steps.
    """
    tb = min(512, _round_up(B, sublane))
    tb = max(tb, sublane)
    while tb > sublane:
        use = (2 * tb * F * x_itemsize          # x, double-buffered
               + 2 * tb * O * 4                 # out, double-buffered (f32)
               + tb * H * 4                     # f32 intermediate h
               + F * H * x_itemsize             # resident W1
               + H * O * x_itemsize             # resident W2
               + (H + O) * 4)                   # resident biases
        if use <= vmem_budget:
            break
        tb //= 2
    return max(_round_up(tb, sublane), sublane)


def critic_block(x, w1, b1, gamma, beta, w2, b2,
                 *, compute_dtype=jnp.float32, batch_tile=None):
    """x: (B, F). Returns (B, out_size) float32.

    compute_dtype: dtype fed to the MXU for x/W1/W2 (use jnp.bfloat16 on v6e/v7x
    to halve HBM traffic; elementwise/LayerNorm math always runs in f32).
    """
    B, F = x.shape
    H = w1.shape[1]
    O = w2.shape[1]

    # Fold the LayerNorm affine into Layer2 (exact algebraic identity):
    #   (c * inv_std * gamma + beta) @ W2 + b2 == (c * inv_std) @ (gamma[:,None]*W2) + (beta@W2 + b2)
    w2_fold = w2 * gamma[:, None]
    b2_fold = beta @ w2 + b2

    x_c = x.astype(compute_dtype)
    w1_c = w1.astype(compute_dtype)
    w2_c = w2_fold.astype(compute_dtype)
    b1_2d = b1.reshape(1, H).astype(jnp.float32)
    b2_2d = b2_fold.reshape(1, O).astype(jnp.float32)

    x_itemsize = jnp.dtype(compute_dtype).itemsize
    sublane = 8 if x_itemsize >= 4 else 16       # f32 -> 8 rows/vreg, bf16 -> 16

    tb = batch_tile if batch_tile is not None else _pick_batch_tile(
        B, F, H, O, x_itemsize, sublane)
    tb = max(_round_up(tb, sublane), sublane)

    padded_B = _round_up(B, tb)
    if padded_B != B:
        # Zero-padded rows produce finite values (b1 -> LayerNorm of a constant row
        # with eps keeps it finite); they are sliced off below.
        x_c = jnp.pad(x_c, ((0, padded_B - B), (0, 0)))

    grid = (padded_B // tb,)
    resident = lambda shape: pl.BlockSpec(shape, lambda i: (0,) * len(shape))

    out = pl.pallas_call(
        critic_block_kernel,
        out_shape=jax.ShapeDtypeStruct((padded_B, O), jnp.float32),
        grid=grid,
        in_specs=[
            pl.BlockSpec((tb, F), lambda i: (i, 0)),   # x: tiled over batch
            resident((F, H)),                          # W1 (resident)
            resident((1, H)),                          # b1 (resident)
            resident((H, O)),                          # W2' = gamma*W2 (resident)
            resident((1, O)),                          # b2' = beta@W2 + b2 (resident)
        ],
        out_specs=pl.BlockSpec((tb, O), lambda i: (i, 0)),
        compiler_params=pltpu.CompilerParams(
            dimension_semantics=("parallel",)),
    )(x_c, w1_c, b1_2d, w2_c, b2_2d)

    return out[:B]


def init_params(key, feature_size, out_size):
    """Deterministic synthetic parameters matching CriticBlock shapes."""
    hidden = feature_size // 2
    k1, k2, k3, k4 = jax.random.split(key, 4)
    # PyTorch Linear default init: U(-1/sqrt(fan_in), 1/sqrt(fan_in))
    lim1 = 1.0 / jnp.sqrt(feature_size)
    lim2 = 1.0 / jnp.sqrt(hidden)
    w1 = jax.random.uniform(k1, (feature_size, hidden), jnp.float32, -lim1, lim1)
    b1 = jax.random.uniform(k2, (hidden,), jnp.float32, -lim1, lim1)
    w2 = jax.random.uniform(k3, (hidden, out_size), jnp.float32, -lim2, lim2)
    b2 = jax.random.uniform(k4, (out_size,), jnp.float32, -lim2, lim2)
    gamma = jnp.ones((hidden,), jnp.float32)   # LayerNorm weight
    beta = jnp.zeros((hidden,), jnp.float32)   # LayerNorm bias
    return w1, b1, gamma, beta, w2, b2


def reference(x, w1, b1, gamma, beta, w2, b2):
    h = x @ w1 + b1
    h = jnp.where(h >= 0.0, h, 0.1 * h)
    mean = jnp.mean(h, axis=-1, keepdims=True)
    var = jnp.mean((h - mean) ** 2, axis=-1, keepdims=True)
    hn = (h - mean) / jnp.sqrt(var + 1e-5) * gamma + beta
    return hn @ w2 + b2


if __name__ == "__main__":
    key = jax.random.PRNGKey(0)
    feature_size = 64
    out_size = 8

    kx, kp = jax.random.split(key)
    params = init_params(kp, feature_size, out_size)

    # Case 1: small batch, single grid step (auto tile).
    x_small = jax.random.normal(kx, (8, feature_size), jnp.float32)
    out_small = critic_block(x_small, *params)
    jax.block_until_ready(out_small)
    ref_small = reference(x_small, *params)
    assert out_small.shape == (8, out_size)
    assert jnp.allclose(out_small, ref_small, atol=1e-4, rtol=1e-4), "mismatch (small)"

    # Case 2: batch not a multiple of the tile -> exercises the grid + padding path.
    x_big = jax.random.normal(kx, (20, feature_size), jnp.float32)
    out_big = critic_block(x_big, *params, batch_tile=8)   # grid=(3,), pads 20 -> 24
    jax.block_until_ready(out_big)
    ref_big = reference(x_big, *params)
    assert out_big.shape == (20, out_size)
    assert jnp.allclose(out_big, ref_big, atol=1e-4, rtol=1e-4), "mismatch (gridded)"

    print("KERNEL_OK")
</pallas_src>

<mosaic_0001>
module attributes {stable_mosaic.version = 11 : i64} {
  func.func @critic_block_kernel(%arg0: i32, %arg1: memref<8x64xf32, #tpu.memory_space<vmem>>, %arg2: memref<64x32xf32, #tpu.memory_space<vmem>>, %arg3: memref<1x32xf32, #tpu.memory_space<vmem>>, %arg4: memref<32x8xf32, #tpu.memory_space<vmem>>, %arg5: memref<1x8xf32, #tpu.memory_space<vmem>>, %arg6: memref<8x8xf32, #tpu.memory_space<vmem>>) attributes {dimension_semantics = [#tpu.dimension_semantics<parallel>], iteration_bounds = array<i64: 1>, scalar_prefetch = 0 : i64, scratch_operands = 0 : i64, tpu.core_type = #tpu.core_type<tc>, window_params = [{transform_indices = @transform_0, window_bounds = array<i64: 8, 64>}, {pipeline_mode = #tpu.pipeline_mode<synchronous>, transform_indices = @transform_1, window_bounds = array<i64: 64, 32>}, {pipeline_mode = #tpu.pipeline_mode<synchronous>, transform_indices = @transform_2, window_bounds = array<i64: 1, 32>}, {pipeline_mode = #tpu.pipeline_mode<synchronous>, transform_indices = @transform_3, window_bounds = array<i64: 32, 8>}, {pipeline_mode = #tpu.pipeline_mode<synchronous>, transform_indices = @transform_4, window_bounds = array<i64: 1, 8>}, {transform_indices = @transform_5, window_bounds = array<i64: 8, 8>}]} {
    %c0 = arith.constant 0 : index
    %c0_0 = arith.constant 0 : index
    %0 = vector.load %arg1[%c0, %c0_0] : memref<8x64xf32, #tpu.memory_space<vmem>>, vector<8x64xf32>
    %c0_1 = arith.constant 0 : index
    %c0_2 = arith.constant 0 : index
    %1 = vector.load %arg2[%c0_1, %c0_2] : memref<64x32xf32, #tpu.memory_space<vmem>>, vector<64x32xf32>
    %cst = arith.constant dense<0.000000e+00> : vector<8x32xf32>
    %2 = tpu.matmul %0, %1, %cst {dimension_numbers = #tpu.dot_dimension_numbers<[1], [0], [0], [1], [0, 0, 1, 1], [], []>} : vector<8x64xf32>, vector<64x32xf32>, vector<8x32xf32> -> vector<8x32xf32>
    %c0_3 = arith.constant 0 : index
    %c0_4 = arith.constant 0 : index
    %3 = vector.load %arg3[%c0_3, %c0_4] : memref<1x32xf32, #tpu.memory_space<vmem>>, vector<1x32xf32>
    %4 = vector.broadcast %3 : vector<1x32xf32> to vector<8x32xf32>
    %5 = arith.addf %2, %4 : vector<8x32xf32>
    %cst_5 = arith.constant 0.000000e+00 : f32
    %6 = vector.broadcast %cst_5 : f32 to vector<8x32xf32>
    %7 = arith.cmpf oge, %5, %6 : vector<8x32xf32>
    %cst_6 = arith.constant 1.000000e-01 : f32
    %8 = vector.broadcast %cst_6 : f32 to vector<8x32xf32>
    %9 = arith.mulf %8, %5 : vector<8x32xf32>
    %10 = arith.select %7, %5, %9 : vector<8x32xi1>, vector<8x32xf32>
    %cst_7 = arith.constant dense<0.000000e+00> : vector<8xf32>
    %11 = vector.multi_reduction <add>, %10, %cst_7 [1] : vector<8x32xf32> to vector<8xf32>
    %12 = vector.shape_cast %11 : vector<8xf32> to vector<8x1xf32>
    %cst_8 = arith.constant 3.200000e+01 : f32
    %13 = vector.broadcast %cst_8 : f32 to vector<8x1xf32>
    %14 = arith.divf %12, %13 : vector<8x1xf32>
    %15 = vector.broadcast %14 : vector<8x1xf32> to vector<8x32xf32>
    %16 = arith.subf %10, %15 : vector<8x32xf32>
    %17 = arith.mulf %16, %16 : vector<8x32xf32>
    %cst_9 = arith.constant dense<0.000000e+00> : vector<8xf32>
    %18 = vector.multi_reduction <add>, %17, %cst_9 [1] : vector<8x32xf32> to vector<8xf32>
    %19 = vector.shape_cast %18 : vector<8xf32> to vector<8x1xf32>
    %cst_10 = arith.constant 3.200000e+01 : f32
    %20 = vector.broadcast %cst_10 : f32 to vector<8x1xf32>
    %21 = arith.divf %19, %20 : vector<8x1xf32>
    %cst_11 = arith.constant 9.99999974E-6 : f32
    %22 = vector.broadcast %cst_11 : f32 to vector<8x1xf32>
    %23 = arith.addf %21, %22 : vector<8x1xf32>
    %24 = math.rsqrt %23 : vector<8x1xf32>
    %25 = vector.broadcast %24 : vector<8x1xf32> to vector<8x32xf32>
    %26 = arith.mulf %16, %25 : vector<8x32xf32>
    %c0_12 = arith.constant 0 : index
    %c0_13 = arith.constant 0 : index
    %27 = vector.load %arg4[%c0_12, %c0_13] : memref<32x8xf32, #tpu.memory_space<vmem>>, vector<32x8xf32>
    %cst_14 = arith.constant dense<0.000000e+00> : vector<8x8xf32>
    %28 = tpu.matmul %26, %27, %cst_14 {dimension_numbers = #tpu.dot_dimension_numbers<[1], [0], [0], [1], [0, 0, 1, 1], [], []>} : vector<8x32xf32>, vector<32x8xf32>, vector<8x8xf32> -> vector<8x8xf32>
    %c0_15 = arith.constant 0 : index
    %c0_16 = arith.constant 0 : index
    %29 = vector.load %arg5[%c0_15, %c0_16] : memref<1x8xf32, #tpu.memory_space<vmem>>, vector<1x8xf32>
    %30 = vector.broadcast %29 : vector<1x8xf32> to vector<8x8xf32>
    %31 = arith.addf %28, %30 : vector<8x8xf32>
    %c0_17 = arith.constant 0 : index
    %c0_18 = arith.constant 0 : index
    %32 = vector.load %arg6[%c0_17, %c0_18] : memref<8x8xf32, #tpu.memory_space<vmem>>, vector<8x8xf32>
    tpu.vector_store %arg6[%c0_17, %c0_18], %31 {strides = array<i32>} : memref<8x8xf32, #tpu.memory_space<vmem>>, vector<8x8xf32>,
    return
  }
  func.func @transform_0(%arg0: i32) -> (i32, i32) {
    %c0_i32 = arith.constant 0 : i32
    %c0_i32_0 = arith.constant 0 : i32
    return %arg0, %c0_i32 : i32, i32
  }
  func.func @transform_1(%arg0: i32) -> (i32, i32) {
    %c0_i32 = arith.constant 0 : i32
    %c0_i32_0 = arith.constant 0 : i32
    %c0_i32_1 = arith.constant 0 : i32
    return %c0_i32, %c0_i32_0 : i32, i32
  }
  func.func @transform_2(%arg0: i32) -> (i32, i32) {
    %c0_i32 = arith.constant 0 : i32
    %c0_i32_0 = arith.constant 0 : i32
    %c0_i32_1 = arith.constant 0 : i32
    return %c0_i32, %c0_i32_0 : i32, i32
  }
  func.func @transform_3(%arg0: i32) -> (i32, i32) {
    %c0_i32 = arith.constant 0 : i32
    %c0_i32_0 = arith.constant 0 : i32
    %c0_i32_1 = arith.constant 0 : i32
    return %c0_i32, %c0_i32_0 : i32, i32
  }
  func.func @transform_4(%arg0: i32) -> (i32, i32) {
    %c0_i32 = arith.constant 0 : i32
    %c0_i32_0 = arith.constant 0 : i32
    %c0_i32_1 = arith.constant 0 : i32
    return %c0_i32, %c0_i32_0 : i32, i32
  }
  func.func @transform_5(%arg0: i32) -> (i32, i32) {
    %c0_i32 = arith.constant 0 : i32
    %c0_i32_0 = arith.constant 0 : i32
    return %arg0, %c0_i32 : i32, i32
  }
}

</mosaic_0001>

<bundles_post_ra>
// kernel: tpu_custom_call.1
= control target key start
LH: loop header
LB: loop body
LE: loop exit
PB: predicated region body
PF: predicated region fallthrough
CT: control target
= control target key end

     0   :  { %v304_v1 = vmov 0.0   ;;  %vm305_vm0 = vmmov 0   ;;  %s388_s0 = inlined_call_operand.vmem [shape: f32[8,64], index: 0, kind: input, shape index: {}]   ;;  %s389_s1 = inlined_call_operand.vmem [shape: f32[64,32], index: 1, kind: input, shape index: {}]   ;;  %s390_s2 = inlined_call_operand.vmem [shape: f32[1,32], index: 2, kind: input, shape index: {}]   ;;  %s391_s3 = inlined_call_operand.vmem [shape: f32[32,8], index: 3, kind: input, shape index: {}]   ;;  %s392_s4 = inlined_call_operand.vmem [shape: f32[1,8], index: 4, kind: input, shape index: {}]   ;;  %s393_s5 = inlined_call_operand.hbm [shape: f32[8,8], index: 5, kind: output, shape index: {}]  }
   0x1   :  { %v29_v0 = vld [vmem:[%s389_s1 + $0x38] sm:$0xff]  ;;  %247 = vmatprep.subr.mxu0 %v304_v1  ;;  %v28_v2 = vld [vmem:[%s389_s1 + $0x30] sm:$0xff]  ;;  %263 = vmatprep.mubr.msk.f32.mxu0 %vm305_vm0, %v304_v1  ;;  %v27_v3 = vld [vmem:[%s389_s1 + $0x28] sm:$0xff] }
   0x2   :  { %248 = vmatpush3.msra.mxu0 %v29_v0  ;;  %266 = vmatprep.subr.mxu1 %v304_v1 }
   0x3   :  { %249 = vmatprep.subr.mxu0 %v304_v1  ;;  %274 = vmatprep.mubr.msk.f32.mxu1 %vm305_vm0, %v304_v1 }
   0x4   :  { %10 = vsyncpa [#allocation3], 0  ;;  %250 = vmatpush3.msra.mxu0 %v28_v2  ;;  %v26_v4 = vld [vmem:[%s389_s1 + $0x20] sm:$0xff]  ;;  %v25_v5 = vld [vmem:[%s389_s1 + $0x18] sm:$0xff]  ;;  %vm37_vm1 = vcmask 523264   ;;  %vm114_vm3 = vcmask 261120  }
   0x5   :  { %251 = vmatprep.subr.mxu0 %v304_v1  ;;  %v24_v6 = vld [vmem:[%s389_s1 + $0x10] sm:$0xff]  ;;  %v23_v7 = vld [vmem:[%s389_s1 + $0x8] sm:$0xff]  ;;  %v22_v8 = vld [vmem:[%s389_s1] sm:$0xff]  ;;  %s306_s20 = smov [#allocation2]   ;;  %vm213_vm4 = vcmask 64512  }
   0x6   :  { %252 = vmatpush3.msra.mxu0 %v27_v3  ;;  %v21_v9 = vld [vmem:[%s388_s0] sm:$0xff]  ;;  %v132_v22 = vld [vmem:[%s391_s3 + $0x18] sm:$0xff]  ;;  %v131_v23 = vld [vmem:[%s391_s3 + $0x10] sm:$0xff]  ;;  %s221_s21 = sshll.u32 %s306_s20, 4  ;;  %s222_s21 = int_to_ptr.vmem [resolvable:$true] %s221_s21 }
   0x7   :  { %253 = vmatprep.subr.mxu0 %v304_v1  ;;  %v229_v10 = vld [vmem:[%s390_s2] ss:$0 sm:$0xff]  ;;  %267 = vmatpush3.msra.mxu1 %v132_v22  ;;  %v130_v24 = vld [vmem:[%s391_s3 + $0x8] sm:$0xff]  ;;  %p287_p1 = scmp.lt.s32.totalorder %s222_s21, %s222_s21 }
   0x8   :  { %254 = vmatpush3.msra.mxu0 %v26_v4  ;;  %268 = vmatprep.subr.mxu1 %v304_v1  ;;  %v129_v25 = vld [vmem:[%s391_s3] sm:$0xff]  ;;  %s282_s3 = scalar_lea.vmem %s222_s21, 128 }
   0x9   :  { %255 = vmatprep.subr.mxu0 %v304_v1  ;;  %269 = vmatpush3.msra.mxu1 %v131_v23  ;;  %v231_v31 = vld [vmem:[%s392_s4] ss:$0 sm:$0xff]  ;;  %p283_p0 = scmp.ne.s32.totalorder %s222_s21, %s282_s3  ;;  %p288_p2 = scmp.lt.s32.totalorder %s282_s3, %s282_s3 }
   0xa   :  { %256 = vmatpush3.msra.mxu0 %v25_v5  ;;  %270 = vmatprep.subr.mxu1 %v304_v1 }
   0xb   :  { %257 = vmatprep.subr.mxu0 %v304_v1  ;;  %271 = vmatpush3.msra.mxu1 %v130_v24  ;;  %p289_p3 = por %p288_p2, %p287_p1 }
   0xc   :  { %258 = vmatpush3.msra.mxu0 %v24_v6  ;;  %272 = vmatprep.subr.mxu1 %v304_v1 }
   0xd   :  { %259 = vmatprep.subr.mxu0 %v304_v1  ;;  %273 = vmatpush3.msra.mxu1 %v129_v25  ;;  %p290_p4 = pnand %p289_p3, %p283_p0 }
   0xe   :  { %260 = vmatpush3.msra.mxu0 %v23_v7 }
   0xf   :  { %261 = vmatprep.subr.mxu0 %v304_v1 }
  0x10   :  { %262 = vmatpush3.msra.mxu0 %v22_v8 }
  0x11   :  { %264 = vmatmul.mubr.msk.f32.vlgmr.msra.gmra.mxu0 %vm37_vm1, %v21_v9 }
  0xd1   :  { %v107_v11 = vpop.f32.mrf.mxu0 }
  0xd2   :  { %v108_v12 = vadd.f32 %v229_v10, %v107_v11 }
  0xd3   :  { %v265_v13 = vpop.f32.mrf.mxu0 }
  0xd4   :  { %v112_v14 = vmul.f32 0.1, %v108_v12  ;;  %vm111_vm2 = vcmp.ge.f32.partialorder %v108_v12, 0.0 }
  0xd6   :  { %v113_v15 = vsel %vm111_vm2, %v108_v12, %v112_v14 }
  0xd7   :  { %v115_v16 = vsel %vm114_vm3, %v113_v15, 0.0 }
  0xd8   :  { %116 = vadd.xlane.f32.xlu0 %v115_v16 }
 0x161   :  { %v117_v17 = vpop.xlane.xlu0 %116 }
 0x162   :  { %v119_v18 = vmul.f32 0.03125, %v117_v17 }
 0x164   :  { %v120_v19 = vsub.f32 %v113_v15, %v119_v18 }
 0x166   :  { %v121_v20 = vmul.f32 %v120_v19, %v120_v19 }
 0x168   :  { %v122_v21 = vsel %vm114_vm3, %v121_v20, 0.0 }
 0x169   :  { %123 = vadd.xlane.f32.xlu0 %v122_v21 }
 0x1f2   :  { %v124_v26 = vpop.xlane.xlu0 %123 }
 0x1f3   :  { %v125_v27 = vmul.f32 0.03125, %v124_v26 }
 0x1f5   :  { %v126_v28 = vadd.f32 1e-05, %v125_v27 }
 0x1f7   :  { %280 = vrsqrt.f32 %v126_v28 }
 0x204   :  { %v281_v29 = vpop.eup %280 }
 0x205   :  { %v128_v30 = vmul.f32 %v281_v29, %v120_v19 }
 0x207   :  { %275 = vmatmul.mubr.msk.f32.vlgmr.msra.gmra.mxu1 %vm114_vm3, %v128_v30 }
 0x2c7   :  { %v209_v32 = vpop.f32.mrf.mxu1 }
 0x2c8   :  { %v210_v33 = vadd.f32 %v231_v31, %v209_v32 }
 0x2c9   :  { %v276_v34 = vpop.f32.mrf.mxu1 }
 0x2ca   :  { %214 = vst.msk [vmem:[#allocation2] sm:$0xff] %vm213_vm4, %v210_v33 }
 0x2cb   :  { %293 = shalt.err (!%p290_p4)
}
 0x2cc   :  { %224 = dma.vmem_to_hbm [thread:$0]  %s222_s21, 128, %s393_s5, [#allocation3]  }
 0x2cd   :  { %302 = dma.done.wait [#allocation3], 128  }
 0x2ce   :  { %303 = vsyncadd [#allocation3], 4294967168 }
 0x2cf   :  { %228 = vsyncpa [#allocation3], 1 }

</bundles_post_ra>
